<compile_context>
chip_gen: v7x
topology: tpu7x:2x2x1
jax: 0.10.0
libtpu: 0.0.40
codegen_flags: <defaults>
</compile_context>

<pallas_src>
import functools

import jax
import jax.numpy as jnp
from jax.experimental import pallas as pl
from jax.experimental.pallas import tpu as pltpu

EPS = 1e-5


def _round_up(x, m):
    return (x + m - 1) // m * m


# --------------------------------------------------------------------------- #
# Kernel
# --------------------------------------------------------------------------- #
def mlp_att_binary_kernel(
    res_ref, att_ref,
    w1i_ref, b1i_ref,      # fused image fc1 (com | binary), BN folded
    w1t_ref, b1t_ref,      # text fc1, BN folded
    w2c_ref, b2c_ref,      # fc2_img_com, BN folded
    w2b_ref, b2b_ref,      # fc2_img_binary, BN folded
    w2t_ref, b2t_ref,      # fc2_text, BN folded
    wh_ref, bh_ref,        # fused head: [fc_cls | fc_binary | zero pad]
    out_ref,
    *, nclass,
):
    fc1 = w2c_ref.shape[0]

    def dot_bias(x, w_ref, b_ref):
        # cast LHS to the weight dtype (bf16 on v6e/v7x path), accumulate in f32
        return jnp.dot(x.astype(w_ref.dtype), w_ref[...],
                       preferred_element_type=jnp.float32) + b_ref[...]

    # ---- image branch: one fused (resSize, 2*fc1) matmul; ReLU; dropout=identity ----
    h_img = jnp.maximum(dot_bias(res_ref[...], w1i_ref, b1i_ref), 0.0)   # (tb, 2*fc1)
    img_com = dot_bias(h_img[:, :fc1], w2c_ref, b2c_ref)                 # (tb, fc2)
    img_bin = dot_bias(h_img[:, fc1:], w2b_ref, b2b_ref)                 # (tb, fc2)

    # ---- text branch ----
    h_txt = jnp.maximum(dot_bias(att_ref[...], w1t_ref, b1t_ref), 0.0)
    text = dot_bias(h_txt, w2t_ref, b2t_ref)                             # (tb, fc2)

    # ---- fused head: LHS = [com | bin] ; cols = [fc_cls(com) | fc_binary(com+bin) | 0] ----
    head = dot_bias(jnp.concatenate([img_com, img_bin], axis=1), wh_ref, bh_ref)
    logits = head[:, :nclass]
    mx = jnp.max(logits, axis=1, keepdims=True)
    shifted = logits - mx
    logsm = shifted - jnp.log(jnp.sum(jnp.exp(shifted), axis=1, keepdims=True))

    # ---- single lane-dense packed write: [com | text | log_softmax | binary | pad] ----
    out_ref[...] = jnp.concatenate(
        [img_com, text, logsm, head[:, nclass:]], axis=1).astype(out_ref.dtype)


# --------------------------------------------------------------------------- #
# Wrapper: BN folding, matmul fusion, batch tiling, output unpacking
# --------------------------------------------------------------------------- #
def mlp_att_binary_forward(res, att, params, *, block_b=128, param_dtype=jnp.float32):
    B, res_size = res.shape
    att_size = att.shape[1]
    fc2, fc1 = params["fc2_img_com"][0].shape        # PyTorch (out, in)
    nclass = params["fc_cls"][0].shape[0]

    # ---- fold eval-mode BN into preceding Linear (wrapper-side constant folding) ----
    def fold(lin_p, bn_p):
        W, b = lin_p                                 # W: (out, in), b: (out,)
        g, be, m, v = bn_p
        s = g / jnp.sqrt(v + EPS)
        return W.T * s[None, :], (b - m) * s + be    # (in, out), (out,)

    w1c, b1c = fold(params["fc1_img_com"], params["fc1_img_com_bn"])
    w1b, b1b = fold(params["fc1_img_binary"], params["fc1_img_binary_bn"])
    w1t, b1t = fold(params["fc1_text"], params["fc1_text_bn"])
    w2c, b2c = fold(params["fc2_img_com"], params["fc2_img_com_bn"])
    w2b, b2b = fold(params["fc2_img_binary"], params["fc2_img_binary_bn"])
    w2t, b2t = fold(params["fc2_text"], params["fc2_text_bn"])

    # ---- fuse the two image fc1 layers (shared LHS = res) ----
    w1i = jnp.concatenate([w1c, w1b], axis=1)        # (res_size, 2*fc1)
    b1i = jnp.concatenate([b1c, b1b])

    # ---- fuse fc_cls + fc_binary into one head matmul, padded to a lane-dense width ----
    wcls = params["fc_cls"][0].T                     # (fc2, nclass)
    bcls = params["fc_cls"][1]
    wbin = params["fc_binary"][0].T                  # (fc2, att_size)
    bbin = params["fc_binary"][1]
    pw = _round_up(2 * fc2 + nclass + att_size, 128)         # packed output width
    pad = pw - (2 * fc2 + nclass + att_size)
    wh_top = jnp.concatenate([wcls, wbin], axis=1)            # rows hit by img_embed_com
    wh_bot = jnp.concatenate([jnp.zeros_like(wcls), wbin], axis=1)  # rows hit by binary part
    wh = jnp.pad(jnp.concatenate([wh_top, wh_bot], axis=0), ((0, 0), (0, pad)))
    bh = jnp.pad(jnp.concatenate([bcls, bbin]), (0, pad))

    weights = [w.astype(param_dtype) for w in (w1i, w1t, w2c, w2b, w2t, wh)]
    biases = [b.reshape(1, -1).astype(jnp.float32) for b in (b1i, b1t, b2c, b2b, b2t, bh)]
    w1i, w1t, w2c, w2b, w2t, wh = weights
    b1i, b1t, b2c, b2b, b2t, bh = biases

    # ---- batch tiling (activations/outputs tiled; weights VMEM-resident) ----
    tb = int(min(_round_up(block_b, 8), _round_up(B, 8)))
    Bp = _round_up(B, tb)
    if Bp != B:
        res = jnp.pad(res, ((0, Bp - B), (0, 0)))
        att = jnp.pad(att, ((0, Bp - B), (0, 0)))
    grid = (Bp // tb,)

    def act_spec(feat):
        return pl.BlockSpec((tb, feat), lambda i: (i, 0))

    def const_spec(arr):
        return pl.BlockSpec(arr.shape, lambda i: (0, 0))

    ordered_params = [w1i, b1i, w1t, b1t, w2c, b2c, w2b, b2b, w2t, b2t, wh, bh]
    in_specs = [act_spec(res_size), act_spec(att_size)] + [const_spec(a) for a in ordered_params]

    packed = pl.pallas_call(
        functools.partial(mlp_att_binary_kernel, nclass=nclass),
        out_shape=jax.ShapeDtypeStruct((Bp, pw), jnp.float32),
        grid=grid,
        in_specs=in_specs,
        out_specs=pl.BlockSpec((tb, pw), lambda i: (i, 0)),
        compiler_params=pltpu.CompilerParams(dimension_semantics=("parallel",)),
    )(res, att, *ordered_params)

    packed = packed[:B]
    img_embed_com = packed[:, :fc2]
    text_embed = packed[:, fc2:2 * fc2]
    img_cls = packed[:, 2 * fc2:2 * fc2 + nclass]
    img_binary = packed[:, 2 * fc2 + nclass:2 * fc2 + nclass + att_size]
    return img_embed_com, text_embed, img_cls, img_binary


# --------------------------------------------------------------------------- #
# Parameter construction (PyTorch conventions) + pure-JAX reference
# --------------------------------------------------------------------------- #
def make_params(key, res_size, att_size, fc1, fc2, nclass):
    keys = iter(jax.random.split(key, 48))

    def lin(i, o):
        W = jax.random.normal(next(keys), (o, i), jnp.float32) * 0.05
        b = jax.random.normal(next(keys), (o,), jnp.float32) * 0.05
        return (W, b)

    def bn(o):
        g = jax.random.uniform(next(keys), (o,), jnp.float32, minval=0.5, maxval=1.5)
        be = jax.random.normal(next(keys), (o,), jnp.float32) * 0.05
        m = jax.random.normal(next(keys), (o,), jnp.float32) * 0.05
        v = jax.random.uniform(next(keys), (o,), jnp.float32, minval=0.5, maxval=1.5)
        return (g, be, m, v)

    return {
        "fc1_img_com": lin(res_size, fc1), "fc1_img_com_bn": bn(fc1),
        "fc2_img_com": lin(fc1, fc2), "fc2_img_com_bn": bn(fc2),
        "fc1_img_binary": lin(res_size, fc1), "fc1_img_binary_bn": bn(fc1),
        "fc2_img_binary": lin(fc1, fc2), "fc2_img_binary_bn": bn(fc2),
        "fc1_text": lin(att_size, fc1), "fc1_text_bn": bn(fc1),
        "fc2_text": lin(fc1, fc2), "fc2_text_bn": bn(fc2),
        "fc_cls": lin(fc2, nclass),
        "fc_binary": lin(fc2, att_size),
    }


def ref_forward(res, att, p):
    lin = lambda x, wb: x @ wb[0].T + wb[1]
    bn = lambda x, b: (x - b[2]) / jnp.sqrt(b[3] + EPS) * b[0] + b[1]

    h = jnp.maximum(bn(lin(res, p["fc1_img_com"]), p["fc1_img_com_bn"]), 0.0)
    img_com = bn(lin(h, p["fc2_img_com"]), p["fc2_img_com_bn"])
    hb = jnp.maximum(bn(lin(res, p["fc1_img_binary"]), p["fc1_img_binary_bn"]), 0.0)
    img_bin = bn(lin(hb, p["fc2_img_binary"]), p["fc2_img_binary_bn"])
    img_concat = img_com + img_bin
    ht = jnp.maximum(bn(lin(att, p["fc1_text"]), p["fc1_text_bn"]), 0.0)
    text = bn(lin(ht, p["fc2_text"]), p["fc2_text_bn"])
    img_binary = lin(img_concat, p["fc_binary"])
    img_cls = jax.nn.log_softmax(lin(img_com, p["fc_cls"]), axis=1)
    return img_com, text, img_cls, img_binary


if __name__ == "__main__":
    B, res_size, att_size = 16, 64, 32
    fc1_size, fc2_size, nclass = 128, 64, 16

    key = jax.random.PRNGKey(0)
    k_res, k_att, k_par = jax.random.split(key, 3)
    res = jax.random.normal(k_res, (B, res_size), jnp.float32)
    att = jax.random.normal(k_att, (B, att_size), jnp.float32)
    params = make_params(k_par, res_size, att_size, fc1_size, fc2_size, nclass)

    refs = ref_forward(res, att, params)

    # f32 path, batch-tiled (grid of 2), tight tolerance
    outs = jax.block_until_ready(
        mlp_att_binary_forward(res, att, params, block_b=8, param_dtype=jnp.float32))
    for o, r in zip(outs, refs):
        assert o.shape == r.shape and o.dtype == jnp.float32
        if not jnp.allclose(o, r, atol=1e-3, rtol=1e-3):
            raise AssertionError("f32 Pallas kernel output mismatch vs reference")

    # bf16-weight path (v6e/v7x MXU-native), f32 accumulation, looser tolerance
    outs_bf16 = jax.block_until_ready(
        mlp_att_binary_forward(res, att, params, block_b=16, param_dtype=jnp.bfloat16))
    for o, r in zip(outs_bf16, refs):
        assert o.shape == r.shape
        if not jnp.allclose(o, r, atol=5e-2, rtol=5e-2):
            raise AssertionError("bf16 Pallas kernel output mismatch vs reference")

    print("KERNEL_OK")
</pallas_src>

<mosaic_0001>
module attributes {stable_mosaic.version = 11 : i64} {
  func.func @mlp_att_binary_kernel(%arg0: i32, %arg1: memref<8x64xf32, #tpu.memory_space<vmem>>, %arg2: memref<8x32xf32, #tpu.memory_space<vmem>>, %arg3: memref<64x256xf32, #tpu.memory_space<vmem>>, %arg4: memref<1x256xf32, #tpu.memory_space<vmem>>, %arg5: memref<32x128xf32, #tpu.memory_space<vmem>>, %arg6: memref<1x128xf32, #tpu.memory_space<vmem>>, %arg7: memref<128x64xf32, #tpu.memory_space<vmem>>, %arg8: memref<1x64xf32, #tpu.memory_space<vmem>>, %arg9: memref<128x64xf32, #tpu.memory_space<vmem>>, %arg10: memref<1x64xf32, #tpu.memory_space<vmem>>, %arg11: memref<128x64xf32, #tpu.memory_space<vmem>>, %arg12: memref<1x64xf32, #tpu.memory_space<vmem>>, %arg13: memref<128x128xf32, #tpu.memory_space<vmem>>, %arg14: memref<1x128xf32, #tpu.memory_space<vmem>>, %arg15: memref<8x256xf32, #tpu.memory_space<vmem>>) attributes {dimension_semantics = [#tpu.dimension_semantics<parallel>], iteration_bounds = array<i64: 2>, scalar_prefetch = 0 : i64, scratch_operands = 0 : i64, tpu.core_type = #tpu.core_type<tc>, window_params = [{transform_indices = @transform_0, window_bounds = array<i64: 8, 64>}, {transform_indices = @transform_1, window_bounds = array<i64: 8, 32>}, {pipeline_mode = #tpu.pipeline_mode<synchronous>, transform_indices = @transform_2, window_bounds = array<i64: 64, 256>}, {pipeline_mode = #tpu.pipeline_mode<synchronous>, transform_indices = @transform_3, window_bounds = array<i64: 1, 256>}, {pipeline_mode = #tpu.pipeline_mode<synchronous>, transform_indices = @transform_4, window_bounds = array<i64: 32, 128>}, {pipeline_mode = #tpu.pipeline_mode<synchronous>, transform_indices = @transform_5, window_bounds = array<i64: 1, 128>}, {pipeline_mode = #tpu.pipeline_mode<synchronous>, transform_indices = @transform_6, window_bounds = array<i64: 128, 64>}, {pipeline_mode = #tpu.pipeline_mode<synchronous>, transform_indices = @transform_7, window_bounds = array<i64: 1, 64>}, {pipeline_mode = #tpu.pipeline_mode<synchronous>, transform_indices = @transform_8, window_bounds = array<i64: 128, 64>}, {pipeline_mode = #tpu.pipeline_mode<synchronous>, transform_indices = @transform_9, window_bounds = array<i64: 1, 64>}, {pipeline_mode = #tpu.pipeline_mode<synchronous>, transform_indices = @transform_10, window_bounds = array<i64: 128, 64>}, {pipeline_mode = #tpu.pipeline_mode<synchronous>, transform_indices = @transform_11, window_bounds = array<i64: 1, 64>}, {pipeline_mode = #tpu.pipeline_mode<synchronous>, transform_indices = @transform_12, window_bounds = array<i64: 128, 128>}, {pipeline_mode = #tpu.pipeline_mode<synchronous>, transform_indices = @transform_13, window_bounds = array<i64: 1, 128>}, {transform_indices = @transform_14, window_bounds = array<i64: 8, 256>}]} {
    %c0 = arith.constant 0 : index
    %c0_0 = arith.constant 0 : index
    %0 = vector.load %arg1[%c0, %c0_0] : memref<8x64xf32, #tpu.memory_space<vmem>>, vector<8x64xf32>
    %c0_1 = arith.constant 0 : index
    %c0_2 = arith.constant 0 : index
    %1 = vector.load %arg3[%c0_1, %c0_2] : memref<64x256xf32, #tpu.memory_space<vmem>>, vector<64x256xf32>
    %cst = arith.constant dense<0.000000e+00> : vector<8x256xf32>
    %2 = tpu.matmul %0, %1, %cst {dimension_numbers = #tpu.dot_dimension_numbers<[1], [0], [0], [1], [0, 0, 1, 1], [], []>} : vector<8x64xf32>, vector<64x256xf32>, vector<8x256xf32> -> vector<8x256xf32>
    %c0_3 = arith.constant 0 : index
    %c0_4 = arith.constant 0 : index
    %3 = vector.load %arg4[%c0_3, %c0_4] : memref<1x256xf32, #tpu.memory_space<vmem>>, vector<1x256xf32>
    %4 = vector.broadcast %3 : vector<1x256xf32> to vector<8x256xf32>
    %5 = arith.addf %2, %4 : vector<8x256xf32>
    %cst_5 = arith.constant 0.000000e+00 : f32
    %6 = vector.broadcast %cst_5 : f32 to vector<8x256xf32>
    %7 = arith.maximumf %5, %6 : vector<8x256xf32>
    %8 = vector.extract_strided_slice %7 {offsets = [0, 0], sizes = [8, 128], strides = [1, 1]} : vector<8x256xf32> to vector<8x128xf32>
    %c0_6 = arith.constant 0 : index
    %c0_7 = arith.constant 0 : index
    %9 = vector.load %arg7[%c0_6, %c0_7] : memref<128x64xf32, #tpu.memory_space<vmem>>, vector<128x64xf32>
    %cst_8 = arith.constant dense<0.000000e+00> : vector<8x64xf32>
    %10 = tpu.matmul %8, %9, %cst_8 {dimension_numbers = #tpu.dot_dimension_numbers<[1], [0], [0], [1], [0, 0, 1, 1], [], []>} : vector<8x128xf32>, vector<128x64xf32>, vector<8x64xf32> -> vector<8x64xf32>
    %c0_9 = arith.constant 0 : index
    %c0_10 = arith.constant 0 : index
    %11 = vector.load %arg8[%c0_9, %c0_10] : memref<1x64xf32, #tpu.memory_space<vmem>>, vector<1x64xf32>
    %12 = vector.broadcast %11 : vector<1x64xf32> to vector<8x64xf32>
    %13 = arith.addf %10, %12 : vector<8x64xf32>
    %14 = vector.extract_strided_slice %7 {offsets = [0, 128], sizes = [8, 128], strides = [1, 1]} : vector<8x256xf32> to vector<8x128xf32>
    %c0_11 = arith.constant 0 : index
    %c0_12 = arith.constant 0 : index
    %15 = vector.load %arg9[%c0_11, %c0_12] : memref<128x64xf32, #tpu.memory_space<vmem>>, vector<128x64xf32>
    %cst_13 = arith.constant dense<0.000000e+00> : vector<8x64xf32>
    %16 = tpu.matmul %14, %15, %cst_13 {dimension_numbers = #tpu.dot_dimension_numbers<[1], [0], [0], [1], [0, 0, 1, 1], [], []>} : vector<8x128xf32>, vector<128x64xf32>, vector<8x64xf32> -> vector<8x64xf32>
    %c0_14 = arith.constant 0 : index
    %c0_15 = arith.constant 0 : index
    %17 = vector.load %arg10[%c0_14, %c0_15] : memref<1x64xf32, #tpu.memory_space<vmem>>, vector<1x64xf32>
    %18 = vector.broadcast %17 : vector<1x64xf32> to vector<8x64xf32>
    %19 = arith.addf %16, %18 : vector<8x64xf32>
    %c0_16 = arith.constant 0 : index
    %c0_17 = arith.constant 0 : index
    %20 = vector.load %arg2[%c0_16, %c0_17] : memref<8x32xf32, #tpu.memory_space<vmem>>, vector<8x32xf32>
    %c0_18 = arith.constant 0 : index
    %c0_19 = arith.constant 0 : index
    %21 = vector.load %arg5[%c0_18, %c0_19] : memref<32x128xf32, #tpu.memory_space<vmem>>, vector<32x128xf32>
    %cst_20 = arith.constant dense<0.000000e+00> : vector<8x128xf32>
    %22 = tpu.matmul %20, %21, %cst_20 {dimension_numbers = #tpu.dot_dimension_numbers<[1], [0], [0], [1], [0, 0, 1, 1], [], []>} : vector<8x32xf32>, vector<32x128xf32>, vector<8x128xf32> -> vector<8x128xf32>
    %c0_21 = arith.constant 0 : index
    %c0_22 = arith.constant 0 : index
    %23 = vector.load %arg6[%c0_21, %c0_22] : memref<1x128xf32, #tpu.memory_space<vmem>>, vector<1x128xf32>
    %24 = vector.broadcast %23 : vector<1x128xf32> to vector<8x128xf32>
    %25 = arith.addf %22, %24 : vector<8x128xf32>
    %cst_23 = arith.constant 0.000000e+00 : f32
    %26 = vector.broadcast %cst_23 : f32 to vector<8x128xf32>
    %27 = arith.maximumf %25, %26 : vector<8x128xf32>
    %c0_24 = arith.constant 0 : index
    %c0_25 = arith.constant 0 : index
    %28 = vector.load %arg11[%c0_24, %c0_25] : memref<128x64xf32, #tpu.memory_space<vmem>>, vector<128x64xf32>
    %cst_26 = arith.constant dense<0.000000e+00> : vector<8x64xf32>
    %29 = tpu.matmul %27, %28, %cst_26 {dimension_numbers = #tpu.dot_dimension_numbers<[1], [0], [0], [1], [0, 0, 1, 1], [], []>} : vector<8x128xf32>, vector<128x64xf32>, vector<8x64xf32> -> vector<8x64xf32>
    %c0_27 = arith.constant 0 : index
    %c0_28 = arith.constant 0 : index
    %30 = vector.load %arg12[%c0_27, %c0_28] : memref<1x64xf32, #tpu.memory_space<vmem>>, vector<1x64xf32>
    %31 = vector.broadcast %30 : vector<1x64xf32> to vector<8x64xf32>
    %32 = arith.addf %29, %31 : vector<8x64xf32>
    %33 = tpu.concatenate %13, %19 in 1 : vector<8x64xf32>, vector<8x64xf32> -> vector<8x128xf32>
    %c0_29 = arith.constant 0 : index
    %c0_30 = arith.constant 0 : index
    %34 = vector.load %arg13[%c0_29, %c0_30] : memref<128x128xf32, #tpu.memory_space<vmem>>, vector<128x128xf32>
    %cst_31 = arith.constant dense<0.000000e+00> : vector<8x128xf32>
    %35 = tpu.matmul %33, %34, %cst_31 {dimension_numbers = #tpu.dot_dimension_numbers<[1], [0], [0], [1], [0, 0, 1, 1], [], []>} : vector<8x128xf32>, vector<128x128xf32>, vector<8x128xf32> -> vector<8x128xf32>
    %c0_32 = arith.constant 0 : index
    %c0_33 = arith.constant 0 : index
    %36 = vector.load %arg14[%c0_32, %c0_33] : memref<1x128xf32, #tpu.memory_space<vmem>>, vector<1x128xf32>
    %37 = vector.broadcast %36 : vector<1x128xf32> to vector<8x128xf32>
    %38 = arith.addf %35, %37 : vector<8x128xf32>
    %39 = vector.extract_strided_slice %38 {offsets = [0, 0], sizes = [8, 16], strides = [1, 1]} : vector<8x128xf32> to vector<8x16xf32>
    %cst_34 = arith.constant dense<0xFF800000> : vector<8xf32>
    %40 = vector.multi_reduction <maximumf>, %39, %cst_34 [1] : vector<8x16xf32> to vector<8xf32>
    %41 = vector.shape_cast %40 : vector<8xf32> to vector<8x1xf32>
    %42 = vector.broadcast %41 : vector<8x1xf32> to vector<8x16xf32>
    %43 = arith.subf %39, %42 : vector<8x16xf32>
    %44 = math.exp %43 : vector<8x16xf32>
    %cst_35 = arith.constant dense<0.000000e+00> : vector<8xf32>
    %45 = vector.multi_reduction <add>, %44, %cst_35 [1] : vector<8x16xf32> to vector<8xf32>
    %46 = vector.shape_cast %45 : vector<8xf32> to vector<8x1xf32>
    %47 = math.log %46 : vector<8x1xf32>
    %48 = vector.broadcast %47 : vector<8x1xf32> to vector<8x16xf32>
    %49 = arith.subf %43, %48 : vector<8x16xf32>
    %50 = vector.extract_strided_slice %38 {offsets = [0, 16], sizes = [8, 112], strides = [1, 1]} : vector<8x128xf32> to vector<8x112xf32>
    %51 = tpu.concatenate %13, %32, %49, %50 in 1 : vector<8x64xf32>, vector<8x64xf32>, vector<8x16xf32>, vector<8x112xf32> -> vector<8x256xf32>
    %c0_36 = arith.constant 0 : index
    %c0_37 = arith.constant 0 : index
    %52 = vector.load %arg15[%c0_36, %c0_37] : memref<8x256xf32, #tpu.memory_space<vmem>>, vector<8x256xf32>
    tpu.vector_store %arg15[%c0_36, %c0_37], %51 {strides = array<i32>} : memref<8x256xf32, #tpu.memory_space<vmem>>, vector<8x256xf32>,
    return
  }
  func.func @transform_0(%arg0: i32) -> (i32, i32) {
    %c0_i32 = arith.constant 0 : i32
    %c0_i32_0 = arith.constant 0 : i32
    return %arg0, %c0_i32 : i32, i32
  }
  func.func @transform_1(%arg0: i32) -> (i32, i32) {
    %c0_i32 = arith.constant 0 : i32
    %c0_i32_0 = arith.constant 0 : i32
    return %arg0, %c0_i32 : i32, i32
  }
  func.func @transform_2(%arg0: i32) -> (i32, i32) {
    %c0_i32 = arith.constant 0 : i32
    %c0_i32_0 = arith.constant 0 : i32
    %c0_i32_1 = arith.constant 0 : i32
    return %c0_i32, %c0_i32_0 : i32, i32
  }
  func.func @transform_3(%arg0: i32) -> (i32, i32) {
    %c0_i32 = arith.constant 0 : i32
    %c0_i32_0 = arith.constant 0 : i32
    %c0_i32_1 = arith.constant 0 : i32
    return %c0_i32, %c0_i32_0 : i32, i32
  }
  func.func @transform_4(%arg0: i32) -> (i32, i32) {
    %c0_i32 = arith.constant 0 : i32
    %c0_i32_0 = arith.constant 0 : i32
    %c0_i32_1 = arith.constant 0 : i32
    return %c0_i32, %c0_i32_0 : i32, i32
  }
  func.func @transform_5(%arg0: i32) -> (i32, i32) {
    %c0_i32 = arith.constant 0 : i32
    %c0_i32_0 = arith.constant 0 : i32
    %c0_i32_1 = arith.constant 0 : i32
    return %c0_i32, %c0_i32_0 : i32, i32
  }
  func.func @transform_6(%arg0: i32) -> (i32, i32) {
    %c0_i32 = arith.constant 0 : i32
    %c0_i32_0 = arith.constant 0 : i32
    %c0_i32_1 = arith.constant 0 : i32
    return %c0_i32, %c0_i32_0 : i32, i32
  }
  func.func @transform_7(%arg0: i32) -> (i32, i32) {
    %c0_i32 = arith.constant 0 : i32
    %c0_i32_0 = arith.constant 0 : i32
    %c0_i32_1 = arith.constant 0 : i32
    return %c0_i32, %c0_i32_0 : i32, i32
  }
  func.func @transform_8(%arg0: i32) -> (i32, i32) {
    %c0_i32 = arith.constant 0 : i32
    %c0_i32_0 = arith.constant 0 : i32
    %c0_i32_1 = arith.constant 0 : i32
    return %c0_i32, %c0_i32_0 : i32, i32
  }
  func.func @transform_9(%arg0: i32) -> (i32, i32) {
    %c0_i32 = arith.constant 0 : i32
    %c0_i32_0 = arith.constant 0 : i32
    %c0_i32_1 = arith.constant 0 : i32
    return %c0_i32, %c0_i32_0 : i32, i32
  }
  func.func @transform_10(%arg0: i32) -> (i32, i32) {
    %c0_i32 = arith.constant 0 : i32
    %c0_i32_0 = arith.constant 0 : i32
    %c0_i32_1 = arith.constant 0 : i32
    return %c0_i32, %c0_i32_0 : i32, i32
  }
  func.func @transform_11(%arg0: i32) -> (i32, i32) {
    %c0_i32 = arith.constant 0 : i32
    %c0_i32_0 = arith.constant 0 : i32
    %c0_i32_1 = arith.constant 0 : i32
    return %c0_i32, %c0_i32_0 : i32, i32
  }
  func.func @transform_12(%arg0: i32) -> (i32, i32) {
    %c0_i32 = arith.constant 0 : i32
    %c0_i32_0 = arith.constant 0 : i32
    %c0_i32_1 = arith.constant 0 : i32
    return %c0_i32, %c0_i32_0 : i32, i32
  }
  func.func @transform_13(%arg0: i32) -> (i32, i32) {
    %c0_i32 = arith.constant 0 : i32
    %c0_i32_0 = arith.constant 0 : i32
    %c0_i32_1 = arith.constant 0 : i32
    return %c0_i32, %c0_i32_0 : i32, i32
  }
  func.func @transform_14(%arg0: i32) -> (i32, i32) {
    %c0_i32 = arith.constant 0 : i32
    %c0_i32_0 = arith.constant 0 : i32
    return %arg0, %c0_i32 : i32, i32
  }
}

</mosaic_0001>

<bundles_post_ra>
// kernel: tpu_custom_call.1
= control target key start
LH: loop header
LB: loop body
LE: loop exit
PB: predicated region body
PF: predicated region fallthrough
CT: control target
= control target key end

     0   :  { %s2145_s0 = inlined_call_operand.vmem [shape: f32[16,64], index: 0, kind: input, shape index: {}]   ;;  %s2146_s1 = inlined_call_operand.vmem [shape: f32[16,32], index: 1, kind: input, shape index: {}]   ;;  %s2147_s2 = inlined_call_operand.vmem [shape: f32[64,256], index: 2, kind: input, shape index: {}]   ;;  %s2148_s3 = inlined_call_operand.vmem [shape: f32[1,256], index: 3, kind: input, shape index: {}]   ;;  %s2149_s4 = inlined_call_operand.vmem [shape: f32[32,128], index: 4, kind: input, shape index: {}]   ;;  %s2150_s5 = inlined_call_operand.vmem [shape: f32[1,128], index: 5, kind: input, shape index: {}]   ;;  %s2151_s6 = inlined_call_operand.vmem [shape: f32[128,64], index: 6, kind: input, shape index: {}]   ;;  %s2152_s7 = inlined_call_operand.vmem [shape: f32[1,64], index: 7, kind: input, shape index: {}]   ;;  %s2153_s8 = inlined_call_operand.vmem [shape: f32[128,64], index: 8, kind: input, shape index: {}]   ;;  %s2154_s9 = inlined_call_operand.vmem [shape: f32[1,64], index: 9, kind: input, shape index: {}]   ;;  %s2155_s10 = inlined_call_operand.vmem [shape: f32[128,64], index: 10, kind: input, shape index: {}]   ;;  %s2156_s11 = inlined_call_operand.vmem [shape: f32[1,64], index: 11, kind: input, shape index: {}]   ;;  %s2157_s12 = inlined_call_operand.vmem [shape: f32[128,128], index: 12, kind: input, shape index: {}]   ;;  %s2158_s13 = inlined_call_operand.vmem [shape: f32[1,128], index: 13, kind: input, shape index: {}]   ;;  %s2159_s14 = inlined_call_operand.hbm [shape: f32[16,256], index: 14, kind: output, shape index: {}]  }
   0x1   :  { %2165 = sst [smem:[#allocation9_spill]] %s2145_s0 }
   0x2   :  { %19 = vsyncpa [#allocation3], 0 }
   0x3   :  { %21 = vsyncpa [#allocation3 + $0x1], 0  ;;  %s1710_s29 = smov 0   ;;  %s1712_s30 = smov 0  }
   0x4   :  { %s1714_s15 = smov 0   ;;  %s1716_s16 = smov 0  }
   0x5 LB: > { %2166 = sst [smem:[#allocation5_spill]] %s1624_s15  ;;  %s1731_s17 = sadd.s32 4294967295, %s1628_s16   ;;  %s1628_s16 = sphi %s1716_s16, %s2175_s16   ;;  %s1624_s15 = sphi %s1714_s15, %s2177_s15   ;;  %s1620_s30 = sphi %s1712_s30, %s2179_s30   ;;  %s1616_s29 = sphi %s1710_s29, %s2178_s29  }
   0x6   : > { %s1157_s18 = sadd.s32 4294967294, %s1628_s16   ;;  %s1735_s19 = sadd.s32 1, %s1628_s16  }
   0x7   : > { %2167 = sst [smem:[#allocation6_spill]] %s1735_s19  ;;  %s338_s20 = sadd.s32 1, %s1624_s15 }
   0x8   : > { %s335_s21 = ssub.s32 %s1628_s16, %s1735_s19  ;;  %p348_p0 = scmp.ne.s32.totalorder %s1624_s15, %s1620_s30 }
   0x9   : > { %p336_p1 = scmp.eq.s32.totalorder %s335_s21, 0  ;;  %p349_p2 = scmp.eq.s32.totalorder %s1731_s17, 1 }
   0xa   : > { %p354_p3 = scmp.ne.s32.totalorder %s1620_s30, %s1616_s29  ;;  %p355_p4 = scmp.eq.s32.totalorder %s1157_s18, 1 }
   0xb   : > { %s1746_s22 = scalar_select %p336_p1, %s1624_s15, %s338_s20  }
   0xc   : > { %p1748_p5 = por %p349_p2, %p348_p0  ;;  %p1752_p6 = por %p355_p4, %p354_p3 }
   0xd   : > { %2168 = sst [smem:[#allocation7_spill]] %s1746_s22  ;;  %p1160_p7 = scmp.ge.s32.totalorder %s1628_s16, 1 }
   0xe   : > { %s2170_s24 = scalar_select %p1752_p6, 1, 0 }
   0xf   : > { %p423_p8 = scmp.lt.s32.totalorder %s1628_s16, 3 }
  0x10   : > { %2171 = sst [smem:[#allocation8_spill]] %s2170_s24 }
  0x11   : > { %p424_p9 = pnand %p1160_p7, %p423_p8 }
  0x12   : > { %v482_v0 = vld [vmem:[%s2147_s2 + $0x8] sm:$0xff] (!%p424_p9)  ;;  %v484_v1 = vld [vmem:[%s2147_s2 + $0x18] sm:$0xff] (!%p424_p9)  ;;  %v481_v2 = vld [vmem:[%s2147_s2] sm:$0xff] (!%p424_p9)  ;;  %v1630_v7 = vmov (!%p424_p9), 0.0   ;;  %p472_p10 = scmp.lt.s32.totalorder (!%p424_p9), %s1731_s17, 1  ;;  %v1631_v13 = vmov (!%p424_p9), 0.0|0.0  }
  0x13   : > { %427 = sbr.rel (%p424_p9) target bundleno = 1129 (0x469), region = 76  ;;  %v1401_v3 = vpack.c.bf16 (!%p424_p9), %v484_v1, %v482_v0  ;;  %v483_v4 = vld [vmem:[%s2147_s2 + $0x10] sm:$0xff] (!%p424_p9)  ;;  %v486_v5 = vld [vmem:[%s2147_s2 + $0x28] sm:$0xff] (!%p424_p9)  ;;  %v488_v6 = vld [vmem:[%s2147_s2 + $0x38] sm:$0xff] (!%p424_p9)  ;;  %577 = vmatprep.mubr.f32.mxu0 (!%p424_p9), %v1630_v7  ;;  %1417 = vmatprep.subr.bf16.mxu1 (!%p424_p9), %v1631_v13  ;;  %s2172_s0 = sld [smem:[#allocation9_spill]] (!%p424_p9)  ;;  %vm509_vm0 = vcmask (!%p424_p9), 523264  }
  0x14   : > { %v1403_v8 = vpack.c.bf16 (!%p424_p9), %v483_v4, %v481_v2  ;;  %v1405_v9 = vpack.c.bf16 (!%p424_p9), %v488_v6, %v486_v5  ;;  %v485_v10 = vld [vmem:[%s2147_s2 + $0x20] sm:$0xff] (!%p424_p9)  ;;  %v487_v11 = vld [vmem:[%s2147_s2 + $0x30] sm:$0xff] (!%p424_p9)  ;;  %v490_v12 = vld [vmem:[%s2147_s2 + $0x48] sm:$0xff] (!%p424_p9)  ;;  %vm1632_vm1 = vmmov (!%p424_p9), 0   ;;  %vm784_vm2 = vcmask (!%p424_p9), 261120   ;;  %s1633_s27 = smov (!%p424_p9), 64  }
  0x15   : > { %1402 = vmatprep.subr.bf16.mxu0 (!%p424_p9), %v1401_v3  ;;  %v492_v14 = vld [vmem:[%s2147_s2 + $0x58] sm:$0xff] (!%p424_p9)  ;;  %v1407_v15 = vpack.c.bf16 (!%p424_p9), %v487_v11, %v485_v10  ;;  %v489_v16 = vld [vmem:[%s2147_s2 + $0x40] sm:$0xff] (!%p424_p9)  ;;  %v491_v18 = vld [vmem:[%s2147_s2 + $0x50] sm:$0xff] (!%p424_p9)  ;;  %1282 = vmatprep.mubr.msk.f32.mxu1 (!%p424_p9), %vm1632_vm1, %v1630_v7  ;;  %vm1050_vm3 = vcmask (!%p424_p9), 130048   ;;  %s469_s22 = sand.u32 (!%p424_p9), 1, %s1620_s30  }
  0x16   : > { %1404 = vmatpush1.bf16.msra.mxu0 (!%p424_p9), %v1403_v8  ;;  %v1409_v17 = vpack.c.bf16 (!%p424_p9), %v492_v14, %v490_v12  ;;  %v586_v19 = vld [vmem:[%s2151_s6] sm:$0xff] (!%p424_p9)  ;;  %v587_v20 = vld [vmem:[%s2151_s6 + $0x8] sm:$0xff] (!%p424_p9)  ;;  %v496_v22 = vld [vmem:[%s2147_s2 + $0x78] sm:$0xff] (!%p424_p9)  ;;  %v1411_v26 = vpack.c.bf16 (!%p424_p9), %v491_v18, %v489_v16  ;;  %v499_v12 = vlaneseq (!%p424_p9)  ;;  %s1161_s20 = sshll.u32 (!%p424_p9), %s469_s22, 4 }
  0x17   : > { %1406 = vmatprep.subr.bf16.mxu0 (!%p424_p9), %v1405_v9  ;;  %v494_v21 = vld [vmem:[%s2147_s2 + $0x68] sm:$0xff] (!%p424_p9)  ;;  %v1418_v23 = vpack.c.bf16 (!%p424_p9), %v587_v20, %v586_v19  ;;  %v588_v24 = vld [vmem:[%s2151_s6 + $0x10] sm:$0xff] (!%p424_p9)  ;;  %v589_v25 = vld [vmem:[%s2151_s6 + $0x18] sm:$0xff] (!%p424_p9) }
  0x18   : > { %v493_v27 = vld [vmem:[%s2147_s2 + $0x60] sm:$0xff] (!%p424_p9)  ;;  %v1421_v28 = vpack.c.bf16 (!%p424_p9), %v589_v25, %v588_v24  ;;  %v1413_v29 = vpack.c.bf16 (!%p424_p9), %v496_v22, %v494_v21  ;;  %v495_v30 = vld [vmem:[%s2147_s2 + $0x70] sm:$0xff] (!%p424_p9)  ;;  %v591_v32 = vld [vmem:[%s2151_s6 + $0x28] sm:$0xff] (!%p424_p9)  ;;  %v500_v14 = vshrl.u32 (!%p424_p9), %v499_v12, 7 }
  0x19   : > { %1419 = vmatpush3.bf16.msra.mxu1 (!%p424_p9), %v1418_v23  ;;  %v590_v31 = vld [vmem:[%s2151_s6 + $0x20] sm:$0xff] (!%p424_p9)  ;;  %v1415_v33 = vpack.c.bf16 (!%p424_p9), %v495_v30, %v493_v27  ;;  %v680_v36 = vld [vmem:[%s2153_s8 + $0x8] sm:$0xff] (!%p424_p9)  ;;  %v592_v37 = vld [vmem:[%s2151_s6 + $0x30] sm:$0xff] (!%p424_p9) }
  0x1a   : > { %s1812_s24 = scalar_select %p472_p10, %s1731_s17, 1  ;;  %1408 = vmatpush1.bf16.msra.mxu0 %v1407_v15  ;;  %1420 = vmatprep.subr.bf16.mxu1 %v1631_v13  ;;  %v679_v34 = vld [vmem:[%s2153_s8] sm:$0xff]  ;;  %v1424_v35 = vpack.c.bf16 %v591_v32, %v590_v31  ;;  %v593_v38 = vld [vmem:[%s2151_s6 + $0x38] sm:$0xff]  ;;  %v681_v41 = vld [vmem:[%s2153_s8 + $0x10] sm:$0xff]  ;;  %v501_v15 = vsub.s32 0, %v500_v14 }
  0x1b   : > { %1410 = vmatprep.subr.bf16.mxu0 %v1409_v17  ;;  %v1442_v40 = vpack.c.bf16 %v680_v36, %v679_v34  ;;  %v1427_v42 = vpack.c.bf16 %v593_v38, %v592_v37  ;;  %v682_v43 = vld [vmem:[%s2153_s8 + $0x18] sm:$0xff]  ;;  %v594_v44 = vld [vmem:[%s2151_s6 + $0x40] sm:$0xff]  ;;  %v595_v45 = vld [vmem:[%s2151_s6 + $0x48] sm:$0xff]  ;;  %v505_v17 = vsub.s32 1, %v500_v14 }
  0x1c   : > { %s2164_s18 = sshll.u32 %s1812_s24, 3  ;;  %v1445_v46 = vpack.c.bf16 %v682_v43, %v681_v41  ;;  %v683_v47 = vld [vmem:[%s2153_s8 + $0x20] sm:$0xff]  ;;  %v1430_v48 = vpack.c.bf16 %v595_v45, %v594_v44  ;;  %v684_v49 = vld [vmem:[%s2153_s8 + $0x28] sm:$0xff]  ;;  %v596_v50 = vld [vmem:[%s2151_s6 + $0x50] sm:$0xff] }
  0x1d   : > { %1422 = vmatpush3.bf16.msra.mxu1 %v1421_v28  ;;  %s475_s21 = scalar_lea.vmem %s2172_s0, %s2164_s18  ;;  %v597_v51 = vld [vmem:[%s2151_s6 + $0x58] sm:$0xff]  ;;  %v1448_v52 = vpack.c.bf16 %v684_v49, %v683_v47  ;;  %v685_v53 = vld [vmem:[%s2153_s8 + $0x30] sm:$0xff]  ;;  %v598_v56 = vld [vmem:[%s2151_s6 + $0x60] sm:$0xff]  ;;  %s1176_s0 = sshll.u32 %s1731_s17, 8 }
  0x1e   : > { %1412 = vmatpush1.bf16.msra.mxu0 %v1411_v26  ;;  %1423 = vmatprep.subr.bf16.mxu1 %v1631_v13  ;;  %v480_v39 = vld [vmem:[%s475_s21] sm:$0xff]  ;;  %v1433_v54 = vpack.c.bf16 %v597_v51, %v596_v50  ;;  %v686_v55 = vld [vmem:[%s2153_s8 + $0x38] sm:$0xff]  ;;  %v599_v57 = vld [vmem:[%s2151_s6 + $0x68] sm:$0xff]  ;;  %s2173_s21 = sshll.u32 %s1812_s24, 3  ;;  %s2102_s24 = scalar_lea.hbm %s2159_s14, %s1176_s0 }
  0x1f   : > { %1414 = vmatprep.subr.bf16.mxu0 %v1413_v29  ;;  %v1451_v58 = vpack.c.bf16 %v686_v55, %v685_v53  ;;  %v1436_v59 = vpack.c.bf16 %v599_v57, %v598_v56  ;;  %v687_v60 = vld [vmem:[%s2153_s8 + $0x40] sm:$0xff]  ;;  %v688_v61 = vld [vmem:[%s2153_s8 + $0x48] sm:$0xff]  ;;  %v689_v63 = vld [vmem:[%s2153_s8 + $0x50] sm:$0xff]  ;;  %s479_s18 = scalar_lea.vmem %s2146_s1, %s2173_s21  ;;  %s1634_s17 = smov [#allocation2]  }
  0x20   : > { %v1454_v62 = vpack.c.bf16 %v688_v61, %v687_v60  ;;  %v690_v0 = vld [vmem:[%s2153_s8 + $0x58] sm:$0xff]  ;;  %v691_v2 = vld [vmem:[%s2153_s8 + $0x60] sm:$0xff]  ;;  %v692_v3 = vld [vmem:[%s2153_s8 + $0x68] sm:$0xff]  ;;  %s1570_s28 = sshll.u32 %s1634_s17, 4  ;;  %s1571_s28 = int_to_ptr.vmem [resolvable:$false] %s1570_s28 }
  0x21   : > { %1425 = vmatpush3.bf16.msra.mxu1 %v1424_v35  ;;  %v1457_v1 = vpack.c.bf16 %v690_v0, %v689_v63  ;;  %v1460_v4 = vpack.c.bf16 %v692_v3, %v691_v2  ;;  %v600_v5 = vld [vmem:[%s2151_s6 + $0x70] sm:$0xff]  ;;  %v601_v6 = vld [vmem:[%s2151_s6 + $0x78] sm:$0xff]  ;;  %v497_v16 = vld [vmem:[%s2148_s3] sm:$0x3]  ;;  %s1572_s21 = scalar_lea.vmem %s1571_s28, 512 }
  0x22   : > { %1416 = vmatpush1.bf16.msra.mxu0 %v1415_v33  ;;  %1426 = vmatprep.subr.bf16.mxu1 %v1631_v13  ;;  %v1439_v8 = vpack.c.bf16 %v601_v6, %v600_v5  ;;  %v693_v9 = vld [vmem:[%s2153_s8 + $0x70] sm:$0xff]  ;;  %v694_v10 = vld [vmem:[%s2153_s8 + $0x78] sm:$0xff]  ;;  %v502_v18 = vrot.slane %v497_v16, %v501_v15  ;;  %v506_v19 = vrot.slane %v497_v16, %v505_v17  ;;  %v773_v26 = vld [vmem:[%s2149_s4] sm:$0xff] }
  0x23   : > { %1441 = vmatprep.subr.bf16.mxu0 %v1631_v13  ;;  %v1463_v11 = vpack.c.bf16 %v694_v10, %v693_v9  ;;  %v774_v27 = vld [vmem:[%s2149_s4 + $0x8] sm:$0xff]  ;;  %v957_v28 = vld [vmem:[%s2157_s12] sm:$0xff]  ;;  %v775_v31 = vld [vmem:[%s2149_s4 + $0x10] sm:$0xff] }
  0x24   : > { %v1466_v29 = vpack.c.bf16 %v774_v27, %v773_v26  ;;  %v958_v30 = vld [vmem:[%s2157_s12 + $0x8] sm:$0xff]  ;;  %v776_v32 = vld [vmem:[%s2149_s4 + $0x18] sm:$0xff]  ;;  %v959_v34 = vld [vmem:[%s2157_s12 + $0x10] sm:$0xff] }
  0x25   : > { %1164 = vmatmul.mubr.msk.f32.vlgmr.msra.gmra.mrb[0].mxu0 %vm509_vm0, %v480_v39  ;;  %1428 = vmatpush3.bf16.msra.mxu1 %v1427_v42  ;;  %v1496_v33 = vpack.c.bf16 %v958_v30, %v957_v28  ;;  %v960_v35 = vld [vmem:[%s2157_s12 + $0x18] sm:$0xff]  ;;  %v1469_v36 = vpack.c.bf16 %v776_v32, %v775_v31  ;;  %v961_v38 = vld [vmem:[%s2157_s12 + $0x20] sm:$0xff]  ;;  %v962_v39 = vld [vmem:[%s2157_s12 + $0x28] sm:$0xff] }
  0x26   : > { %1443 = vmatpush3.bf16.msra.mxu0 %v1442_v40  ;;  %1429 = vmatprep.subr.bf16.mxu1 %v1631_v13  ;;  %v1499_v37 = vpack.c.bf16 %v960_v35, %v959_v34  ;;  %v772_v40 = vld [vmem:[%s479_s18] sm:$0xff]  ;;  %v1502_v41 = vpack.c.bf16 %v962_v39, %v961_v38  ;;  %v963_v42 = vld [vmem:[%s2157_s12 + $0x30] sm:$0xff]  ;;  %v964_v43 = vld [vmem:[%s2157_s12 + $0x38] sm:$0xff]  ;;  %s471_s18 = scalar_lea.vmem [#allocation2], %s1161_s20 }
  0x27   : > { %1444 = vmatprep.subr.bf16.mxu0 %v1631_v13  ;;  %1317 = vmatprep.mubr.msk.f32.mxu0 %vm1632_vm1, %v1630_v7  ;;  %v1505_v44 = vpack.c.bf16 %v964_v43, %v963_v42  ;;  %v965_v45 = vld [vmem:[%s2157_s12 + $0x40] sm:$0xff]  ;;  %v970_v51 = vld [vmem:[%s2157_s12 + $0x68] sm:$0xff]  ;;  %v971_v53 = vld [vmem:[%s2157_s12 + $0x70] sm:$0xff]  ;;  %s1086_s15 = sshll.u32 %s471_s18, 4  ;;  %s2104_s15 = int_to_ptr.vmem [resolvable:$true] %s1086_s15 }
  0x28   : > { %v969_v50 = vld [vmem:[%s2157_s12 + $0x60] sm:$0xff]  ;;  %v860_v57 = vld [vmem:[%s2155_s10 + $0x8] sm:$0xff]  ;;  %v862_v60 = vld [vmem:[%s2155_s10 + $0x18] sm:$0xff]  ;;  %s1566_s26 = scalar_lea.vmem %s2104_s15, 256  ;;  %p1573_p0 = scmp.lt.s32.totalorder %s2104_s15, %s1571_s28 }
  0x29   : > { %1431 = vmatpush3.bf16.msra.mxu1 %v1430_v48  ;;  %v968_v48 = vld [vmem:[%s2157_s12 + $0x58] sm:$0xff]  ;;  %v859_v56 = vld [vmem:[%s2155_s10] sm:$0xff]  ;;  %v864_v63 = vld [vmem:[%s2155_s10 + $0x28] sm:$0xff]  ;;  %p1567_p11 = scmp.ne.s32.totalorder %s2104_s15, %s1566_s26  ;;  %p1574_p1 = scmp.lt.s32.totalorder %s1572_s21, %s1566_s26 }
  0x2a   : > { %1446 = vmatpush3.bf16.msra.mxu0 %v1445_v46  ;;  %1432 = vmatprep.subr.bf16.mxu1 %v1631_v13  ;;  %v966_v46 = vld [vmem:[%s2157_s12 + $0x48] sm:$0xff]  ;;  %v1166_v0 = vld [vmem:[%s2154_s9] ss:$0 sm:$0xff]  ;;  %v865_v3 = vld [vmem:[%s2155_s10 + $0x30] sm:$0xff] }
  0x2b   : > { %1447 = vmatprep.subr.bf16.mxu0 %v1631_v13  ;;  %v1508_v47 = vpack.c.bf16 %v966_v46, %v965_v45  ;;  %v868_v12 = vld [vmem:[%s2155_s10 + $0x48] sm:$0xff]  ;;  %v869_v15 = vld [vmem:[%s2155_s10 + $0x50] sm:$0xff]  ;;  %v870_v16 = vld [vmem:[%s2155_s10 + $0x58] sm:$0xff]  ;;  %p1568_p12 = pnand %p1567_p11, %p1748_p5  ;;  %p1575_p2 = por %p1574_p1, %p1573_p0 }
  0x2c   : > { %v1487_v17 = vpack.c.bf16 %v870_v16, %v869_v15 }
  0x2d   : > { %1434 = vmatpush3.bf16.msra.mxu1 %v1433_v54  ;;  %v972_v54 = vld [vmem:[%s2157_s12 + $0x78] sm:$0xff]  ;;  %p1569_p13 = pneg %p1568_p12 }
  0x2e   : > { %1449 = vmatpush3.bf16.msra.mxu0 %v1448_v52  ;;  %1435 = vmatprep.subr.bf16.mxu1 %v1631_v13  ;;  %v1514_v52 = vpack.c.bf16 %v970_v51, %v969_v50  ;;  %v1517_v55 = vpack.c.bf16 %v972_v54, %v971_v53 }
  0x2f   : > { %1450 = vmatprep.subr.bf16.mxu0 %v1631_v13  ;;  %p1576_p3 = pnand %p1575_p2, %p1569_p13 }
  0x31   : > { %1437 = vmatpush3.bf16.msra.mxu1 %v1436_v59  ;;  %v1472_v59 = vpack.c.bf16 %v860_v57, %v859_v56 }
  0x32   : > { %1452 = vmatpush3.bf16.msra.mxu0 %v1451_v58  ;;  %1438 = vmatprep.subr.bf16.mxu1 %v1631_v13  ;;  %v861_v58 = vld [vmem:[%s2155_s10 + $0x10] sm:$0xff] }
  0x33   : > { %1453 = vmatprep.subr.bf16.mxu0 %v1631_v13  ;;  %v1475_v61 = vpack.c.bf16 %v862_v60, %v861_v58 }
  0x35   : > { %1440 = vmatpush3.bf16.msra.mxu1 %v1439_v8 }
  0x36   : > { %1455 = vmatpush3.bf16.msra.mxu0 %v1454_v62  ;;  %1465 = vmatprep.subr.bf16.mxu1 %v1631_v13  ;;  %v863_v62 = vld [vmem:[%s2155_s10 + $0x20] sm:$0xff] }
  0x37   : > { %1456 = vmatprep.subr.bf16.mxu0 %v1631_v13 }
  0x3a   : > { %1458 = vmatpush3.bf16.msra.mxu0 %v1457_v1  ;;  %v1478_v1 = vpack.c.bf16 %v864_v63, %v863_v62 }
  0x3b   : > { %1459 = vmatprep.subr.bf16.mxu0 %v1631_v13 }
  0x3e   : > { %1461 = vmatpush3.bf16.msra.mxu0 %v1460_v4  ;;  %v866_v4 = vld [vmem:[%s2155_s10 + $0x38] sm:$0xff] }
  0x3f   : > { %1462 = vmatprep.subr.bf16.mxu0 %v1631_v13  ;;  %v1481_v10 = vpack.c.bf16 %v866_v4, %v865_v3 }
  0x42   : > { %1464 = vmatpush3.bf16.msra.mxu0 %v1463_v11  ;;  %v867_v11 = vld [vmem:[%s2155_s10 + $0x40] sm:$0xff] }
  0x43   : > { %1495 = vmatprep.subr.bf16.mxu0 %v1631_v13  ;;  %v1484_v14 = vpack.c.bf16 %v868_v12, %v867_v11 }
  0xf8   : > { %v579_v20 = vpop.f32.mrb[0].mxu0 }
  0xf9   : > { %v580_v21 = vadd.f32 %v579_v20, %v502_v18  ;;  %v581_v22 = vpop.f32.mrb[1].mxu0  ;;  %v871_v18 = vld [vmem:[%s2155_s10 + $0x60] sm:$0xff] }
  0xfa   : > { %v582_v23 = vadd.f32 %v581_v22, %v506_v19  ;;  %v872_v19 = vld [vmem:[%s2155_s10 + $0x68] sm:$0xff]  ;;  %v874_v22 = vld [vmem:[%s2155_s10 + $0x78] sm:$0xff] }
  0xfb   : > { %v584_v24 = vmax.f32 %v580_v21, 0.0  ;;  %v1490_v20 = vpack.c.bf16 %v872_v19, %v871_v18  ;;  %v873_v21 = vld [vmem:[%s2155_s10 + $0x70] sm:$0xff] }
  0xfc   : > { %v585_v25 = vmax.f32 %v582_v23, 0.0  ;;  %v1493_v23 = vpack.c.bf16 %v874_v22, %v873_v21 }
  0xfd   : > { %1283 = vmatmul.mubr.f32.vlgmr.msra.gmra.mrb[0].mxu1 %v584_v24  ;;  %v1167_v24 = vld [vmem:[%s2150_s5] ss:$0 sm:$0xff] }
  0xfe   : > { %1318 = vmatmul.mubr.f32.vlgmr.msra.gmra.mrb[2].mxu0 %v585_v25  ;;  %1328 = vmatprep.mubr.msk.f32.mxu1 %vm1632_vm1, %v1630_v7 }
  0xff   : > { %1398 = vmatprep.mubr.msk.f32.mxu0 %vm1632_vm1, %v1630_v7  ;;  %1467 = vmatpush3.bf16.msra.mxu1 %v1466_v29  ;;  %v1165_v29 = vld [vmem:[%s2152_s7] ss:$0 sm:$0xff] }
 0x100   : > { %1497 = vmatpush3.bf16.msra.mxu0 %v1496_v33  ;;  %1468 = vmatprep.subr.bf16.mxu1 %v1631_v13 }
 0x101   : > { %1498 = vmatprep.subr.bf16.mxu0 %v1631_v13 }
 0x103   : > { %1470 = vmatpush3.bf16.msra.mxu1 %v1469_v36 }
 0x104   : > { %1500 = vmatpush3.bf16.msra.mxu0 %v1499_v37  ;;  %1471 = vmatprep.subr.bf16.mxu1 %v1631_v13 }
 0x105   : > { %1501 = vmatprep.subr.bf16.mxu0 %v1631_v13 }
 0x106   : > { %1329 = vmatmul.mubr.msk.f32.vlgmr.msra.gmra.mrb[2].mxu1 %vm784_vm2, %v772_v40 }
 0x107   : > { %1363 = vmatprep.mubr.msk.f32.mxu1 %vm1632_vm1, %v1630_v7  ;;  %v967_v7 = vld [vmem:[%s2157_s12 + $0x50] sm:$0xff]  ;;  %1473 = vmatpush3.bf16.msra.mxu1 %v1472_v59 }
 0x108   : > { %1503 = vmatpush3.bf16.msra.mxu0 %v1502_v41  ;;  %v1511_v49 = vpack.c.bf16 %v968_v48, %v967_v7  ;;  %1474 = vmatprep.subr.bf16.mxu1 %v1631_v13 }
 0x109   : > { %1504 = vmatprep.subr.bf16.mxu0 %v1631_v13 }
 0x10b   : > { %1476 = vmatpush3.bf16.msra.mxu1 %v1475_v61 }
 0x10c   : > { %1506 = vmatpush3.bf16.msra.mxu0 %v1505_v44  ;;  %1477 = vmatprep.subr.bf16.mxu1 %v1631_v13  ;;  %v1169_v44 = vld [vmem:[%s2156_s11] ss:$0 sm:$0xff] }
 0x10d   : > { %1507 = vmatprep.subr.bf16.mxu0 %v1631_v13 }
 0x10f   : > { %1479 = vmatpush3.bf16.msra.mxu1 %v1478_v1 }
 0x110   : > { %1509 = vmatpush3.bf16.msra.mxu0 %v1508_v47  ;;  %1480 = vmatprep.subr.bf16.mxu1 %v1631_v13 }
 0x111   : > { %1510 = vmatprep.subr.bf16.mxu0 %v1631_v13 }
 0x113   : > { %1482 = vmatpush3.bf16.msra.mxu1 %v1481_v10 }
 0x114   : > { %1512 = vmatpush3.bf16.msra.mxu0 %v1511_v49  ;;  %1483 = vmatprep.subr.bf16.mxu1 %v1631_v13 }
 0x115   : > { %1513 = vmatprep.subr.bf16.mxu0 %v1631_v13 }
 0x117   : > { %1485 = vmatpush3.bf16.msra.mxu1 %v1484_v14 }
 0x118   : > { %1515 = vmatpush3.bf16.msra.mxu0 %v1514_v52  ;;  %1486 = vmatprep.subr.bf16.mxu1 %v1631_v13 }
 0x119   : > { %1516 = vmatprep.subr.bf16.mxu0 %v1631_v13 }
 0x11b   : > { %1488 = vmatpush3.bf16.msra.mxu1 %v1487_v17 }
 0x11c   : > { %1518 = vmatpush3.bf16.msra.mxu0 %v1517_v55  ;;  %1489 = vmatprep.subr.bf16.mxu1 %v1631_v13 }
 0x11f   : > { %1491 = vmatpush3.bf16.msra.mxu1 %v1490_v20 }
 0x120   : > { %1492 = vmatprep.subr.bf16.mxu1 %v1631_v13  ;;  %v1170_v13 = vld [vmem:[%s2158_s13] ss:$0 sm:$0xff] }
 0x123   : > { %1494 = vmatpush3.bf16.msra.mxu1 %v1493_v23 }
 0x1d0   : > { %v675_v2 = vpop.f32.mrb[0].mxu1 }
 0x1d1   : > { %v1284_v5 = vpop.f32.mrb[1].mxu1  ;;  %v768_v6 = vpop.f32.mrb[2].mxu0  ;;  %v676_v30 = vadd.f32 %v1165_v29, %v675_v2 }
 0x1d2   : > { %v769_v8 = vadd.f32 %v1166_v0, %v768_v6  ;;  %v1319_v9 = vpop.f32.mrb[3].mxu0 }
 0x1d4   : > { %953 = vrot.lane.b32.xlu0 %v769_v8, %s1633_s27 }
 0x1d9   : > { %v854_v25 = vpop.f32.mrb[2].mxu1 }
 0x1da   : > { %v855_v26 = vadd.f32 %v1167_v24, %v854_v25  ;;  %v1330_v27 = vpop.f32.mrb[3].mxu1 }
 0x1dc   : > { %v858_v28 = vmax.f32 %v855_v26, 0.0 }
 0x1de   : > { %1364 = vmatmul.mubr.f32.vlgmr.msra.gmra.mrb[4].mxu1 %v858_v28 }
 0x246   : > { %v954_v31 = vpop.permute.xlu0 %953 }
 0x247   : > { %v956_v32 = vsel %vm509_vm0, %v676_v30, %v954_v31 }
 0x248   : > { %1399 = vmatmul.mubr.f32.vlgmr.msra.gmra.mrb[4].mxu0 %v956_v32 }
 0x2b1   : > { %v948_v37 = vpop.f32.mrb[4].mxu1 }
 0x2b2   : > { %v1365_v38 = vpop.f32.mrb[5].mxu1  ;;  %v949_v45 = vadd.f32 %v1169_v44, %v948_v37 }
 0x31b   : > { %v1046_v33 = vpop.f32.mrb[4].mxu0 }
 0x31c   : > { %v1047_v34 = vadd.f32 %v1170_v13, %v1046_v33  ;;  %v1400_v35 = vpop.f32.mrb[5].mxu0 }
 0x31e   : > { %v1051_v36 = vsel %vm1050_vm3, %v1047_v34, -inf }
 0x31f   : > { %1052 = vmax.xlane.f32.xlu0 %v1051_v36 }
 0x3ac   : > { %v1053_v39 = vpop.xlane.xlu0 %1052 }
 0x3ad   : > { %v1054_v40 = vsub.f32 %v1047_v34, %v1053_v39 }
 0x3af   : > { %v1055_v41 = vmul.f32 1.442695, %v1054_v40 }
 0x3b1   : > { %1562 = vpow2.f32 %v1055_v41 }
 0x3bb   : > { %v1563_v42 = vpop.eup %1562 }
 0x3bc   : > { %v1057_v43 = vsel %vm1050_vm3, %v1563_v42, 0.0 }
 0x3bd   : > { %1058 = vadd.xlane.f32.xlu1 %v1057_v43 }
 0x3ce   : > { %1064 = vrot.lane.b32.xlu1 %v949_v45, %s1633_s27  ;;  %s1072_s27 = scalar_lea.sflag [#allocation3], %s469_s22 }
 0x44a   : > { %v1059_v46 = vpop.xlane.xlu1 %1058 }
 0x44b   : > { %1564 = vlog2.f32 %v1059_v46 }
 0x44e   : > { %v1065_v47 = vpop.permute.xlu1 %1064 }
 0x44f   : > { %v1067_v7 = vsel %vm509_vm0, %v676_v30, %v1065_v47 }
 0x450   : > { %1069 = vst [vmem:[%s471_s18] sm:$0xff] %v1067_v7 }
 0x455   : > { %v1565_v48 = vpop.eup %1564 }
 0x456   : > { %v1061_v49 = vmul.f32 0.6931472, %v1565_v48 }
 0x458   : > { %v1062_v50 = vsub.f32 %v1054_v40, %v1061_v49 }
 0x45a   : > { %v1068_v51 = vsel %vm1050_vm3, %v1062_v50, %v1047_v34 }
 0x45b   : > { %1070 = vst [vmem:[%s471_s18 + $0x8] sm:$0xff] %v1068_v51 }
 0x45c   : > { %1579 = shalt.err (!%p1576_p3)
}
 0x45d   : > { %s1580_s22 = scalar_lea.hbm %s2102_s24, 256  ;;  %s1584_s0 = scalar_lea.hbm %s2159_s14, 512 }
 0x45e   : > { %p1581_p4 = scmp.ne.s32.totalorder %s2102_s24, %s1580_s22  ;;  %p1585_p9 = scmp.lt.u32.totalorder %s2102_s24, %s2159_s14 }
 0x45f   : > { %p1586_p10 = scmp.lt.u32.totalorder %s1584_s0, %s1580_s22  ;;  %p1588_p12 = scmp.lt.u32.totalorder %s1580_s22, %s2102_s24 }
 0x460   : > { %p1582_p7 = pnand %p1581_p4, %p1748_p5 }
 0x461   : > { %p1587_p11 = por %p1586_p10, %p1585_p9 }
 0x462   : > { %p1583_p8 = pneg %p1582_p7 }
 0x463   : > { %p1589_p13 = por %p1588_p12, %p1587_p11 }
 0x465   : > { %p1590_p0 = pnand %p1589_p13, %p1583_p8 }
 0x467   : > { %1593 = shalt.err (!%p1590_p0)
}
 0x468   : > { %1519 = dma.vmem_to_hbm [thread:$0]  (%p1748_p5), %s2104_s15, 256, %s2102_s24, %s1072_s27  }
 0x469 PF: > { %p1525_p1 = scmp.ge.s32.totalorder %s1628_s16, 2  ;;  %s1098_s17 = sand.u32 1, %s1616_s29  }
 0x46a   : > { %s1099_s28 = scalar_lea.sflag [#allocation3], %s1098_s17 }
 0x46b   : > { %p1522_p2 = pnand %p1525_p1, %p1752_p6 }
 0x46d   : > { %1611 = dma.done.wait (!%p1522_p2), %s1099_s28, 256  }
 0x46e   : > { %1613 = vsyncadd (!%p1522_p2), %s1099_s28, 4294967040  ;;  %s2175_s16 = sld [smem:[#allocation6_spill]]  ;;  %s2176_s21 = sld [smem:[#allocation5_spill]] }
 0x46f   : > { %s2177_s15 = sld [smem:[#allocation7_spill]]  ;;  %s2178_s29 = smov %s1620_s30 }
 0x474   : > { %p24_p3 = scmp.ge.s32.totalorder %s2175_s16, 4   ;;  %s2179_s30 = smov %s2176_s21 }
 0x476   :  { %26 = sbr.rel (!%p24_p3) target bundleno = 5 (0x5), region = 114 }
 0x47d   :  { %1104 = vsyncpa [#allocation3], 1 }
 0x47e   :  { %1106 = vsyncpa [#allocation3 + $0x1], 1 }

</bundles_post_ra>
